<compile_context>
chip_gen: v7x
topology: tpu7x:2x2x1
jax: 0.10.0
libtpu: 0.0.40
codegen_flags: <defaults>
</compile_context>

<pallas_src>
import functools

import jax
import jax.numpy as jnp
from jax.experimental import pallas as pl
from jax.experimental.pallas import tpu as pltpu

NODE_IN = 1
EDGE_IN = 3
EDGE_OUT = 3
HID = 2
IN_FEAT = NODE_IN * 2 + EDGE_IN            # 5
LANES = 128

# Packed-parameter layout (all f32, lives in SMEM):
#   [ w1 (5x2, row-major) | b1 (2) | w2[:, 2] (2) | b2[2] (1) ]
_W1_OFF = 0
_B1_OFF = _W1_OFF + IN_FEAT * HID          # 10
_W2_OFF = _B1_OFF + HID                    # 12
_B2_OFF = _W2_OFF + HID                    # 14
N_PARAMS = _B2_OFF + 1                     # 15


def edge_model_kernel(p_ref, vi_ref, vj_ref, ea_ref, out_ref):
    # vi/vj: (r_tile, 128); ea/out: (3, r_tile, 128).  All vregs fully dense.
    vi = vi_ref[...]
    vj = vj_ref[...]
    d = ea_ref[0, :, :]
    a = ea_ref[1, :, :]
    b = ea_ref[2, :, :]

    # --- MLP, surviving column only: Linear(5,2) -> ReLU -> Linear(2,3)[:, 2]
    # (columns 0 and 1 of the MLP output are overwritten below, so they are
    # never computed).  All scalar weights come from SMEM; pure VPU FMAs.
    def w1(k, j):
        return p_ref[_W1_OFF + k * HID + j]

    h0 = (w1(0, 0) * vi + w1(1, 0) * vj + w1(2, 0) * d + w1(3, 0) * a
          + w1(4, 0) * b + p_ref[_B1_OFF + 0])
    h1 = (w1(0, 1) * vi + w1(1, 1) * vj + w1(2, 1) * d + w1(3, 1) * a
          + w1(4, 1) * b + p_ref[_B1_OFF + 1])
    h0 = jnp.maximum(h0, 0.0)
    h1 = jnp.maximum(h1, 0.0)
    out2 = p_ref[_W2_OFF + 0] * h0 + p_ref[_W2_OFF + 1] * h1 + p_ref[_B2_OFF]

    # --- symbolic columns 0 and 1 ---
    out0 = (jnp.abs((vi / 0.9484139 - (vj - 0.2123214)) * -1.3248432)
            + (d - 1.7348461 + b + vj) * -0.12084719)
    out1 = (jnp.abs((vi - vj * 1.0584362) * 1.5344211 + 0.45368108)
            + (vi - vj * 1.0239582) * 1.931712 + 0.546892)

    # Fully dense (sublane x lane) stores.
    out_ref[0, :, :] = out0
    out_ref[1, :, :] = out1
    out_ref[2, :, :] = out2


def _round_up(x, m):
    return (x + m - 1) // m * m


def _pack_params(w1, b1, w2, b2):
    return jnp.concatenate([
        w1.reshape(-1), b1.reshape(-1), w2[:, 2].reshape(-1),
        b2.reshape(-1)[2:3],
    ]).astype(jnp.float32)


@functools.partial(jax.jit, static_argnames=("tile_e",))
def edge_model_forward_feature_major(vi, vj, edge_attr_fm, w1, b1, w2, b2,
                                     tile_e=131072):
    """Feature-major entry point (no wrapper transposes).

    vi, vj: (E,) flattened src/dest node features.
    edge_attr_fm: (3, E) feature-major edge attributes, rows = [d, a, b].
    Returns (3, E) feature-major output.
    """
    E = vi.shape[0]
    assert vj.shape == (E,) and edge_attr_fm.shape == (EDGE_IN, E)

    vi = vi.astype(jnp.float32)
    vj = vj.astype(jnp.float32)
    ea = edge_attr_fm.astype(jnp.float32)

    # Pad only to a multiple of 128 (needed for the dense 2-D reshape);
    # skipped entirely when E is already 128-aligned.
    e_pad = _round_up(E, LANES)
    if e_pad != E:
        vi = jnp.pad(vi, (0, e_pad - E))
        vj = jnp.pad(vj, (0, e_pad - E))
        ea = jnp.pad(ea, ((0, 0), (0, e_pad - E)))
    rows = e_pad // LANES

    # Rows (of 128 edges each) per grid step: target ~tile_e edges/step
    # (floor 2048), sublane-aligned (multiple of 8), capped so large inputs
    # still give a >=2-step "parallel" grid (v7x has 2 TensorCores).
    # Trailing partial block is handled by the cdiv grid + masked writes.
    tile_e_eff = max(int(tile_e), 2048)
    r_tile = _round_up(max(tile_e_eff // LANES, 8), 8)
    if rows > 16:
        r_tile = min(r_tile, _round_up(pl.cdiv(rows, 2), 8))
    if r_tile >= rows:
        r_tile = rows
    n_steps = pl.cdiv(rows, r_tile)

    # Free reshapes to the dense (rows, 128) layout.
    vi2 = vi.reshape(rows, LANES)
    vj2 = vj.reshape(rows, LANES)
    ea3 = ea.reshape(EDGE_IN, rows, LANES)

    params = _pack_params(w1, b1, w2, b2)

    out3 = pl.pallas_call(
        edge_model_kernel,
        out_shape=jax.ShapeDtypeStruct((EDGE_OUT, rows, LANES), jnp.float32),
        grid_spec=pltpu.PrefetchScalarGridSpec(
            num_scalar_prefetch=0,
            grid=(n_steps,),
            in_specs=[
                pl.BlockSpec(memory_space=pltpu.MemorySpace.SMEM),    # params
                pl.BlockSpec((r_tile, LANES), lambda i: (i, 0)),      # vi
                pl.BlockSpec((r_tile, LANES), lambda i: (i, 0)),      # vj
                pl.BlockSpec((EDGE_IN, r_tile, LANES),
                             lambda i: (0, i, 0)),                    # d,a,b
            ],
            out_specs=pl.BlockSpec((EDGE_OUT, r_tile, LANES),
                                   lambda i: (0, i, 0)),
        ),
        compiler_params=pltpu.CompilerParams(
            dimension_semantics=("parallel",),
            vmem_limit_bytes=32 * 1024 * 1024),
        cost_estimate=pl.CostEstimate(
            flops=45 * e_pad, transcendentals=0, bytes_accessed=32 * e_pad),
    )(params, vi2, vj2, ea3)

    return out3.reshape(EDGE_OUT, e_pad)[:, :E]


@functools.partial(jax.jit, static_argnames=("tile_e",))
def edge_model_forward(src, dest, edge_attr, w1, b1, w2, b2, tile_e=131072):
    """PyTorch-interface wrapper: src/dest (E,1), edge_attr (E,3) -> (E,3).

    The (E,3)<->(3,E) transposes here are pure layout plumbing required by the
    PyTorch interface; callers that keep a feature-major (C, E) layout in the
    surrounding graph should call edge_model_forward_feature_major directly
    and pay zero transpose passes.
    """
    E = src.shape[0]
    assert NODE_IN == 1, "kernel assumes per-edge scalar src/dest (NODE_IN==1)"
    assert src.shape == (E, NODE_IN) and dest.shape == (E, NODE_IN)
    assert edge_attr.shape == (E, EDGE_IN)
    out_fm = edge_model_forward_feature_major(
        src.reshape(E), dest.reshape(E), edge_attr.T,
        w1, b1, w2, b2, tile_e=tile_e)
    return out_fm.T                                      # (E, EDGE_OUT)


def reference_forward(src, dest, edge_attr, w1, b1, w2, b2):
    x = jnp.concatenate([src, dest, edge_attr], axis=1)
    h = jnp.maximum(x @ w1 + b1, 0.0)
    out = h @ w2 + b2
    vi = src[:, 0]
    vj = dest[:, 0]
    d = edge_attr[:, 0]
    b = edge_attr[:, 2]
    out0 = (jnp.abs((vi / 0.9484139 - (vj - 0.2123214)) * -1.3248432)
            + (d - 1.7348461 + b + vj) * -0.12084719)
    out1 = (jnp.abs((vi - vj * 1.0584362) * 1.5344211 - (-0.45368108))
            + (vi - vj * 1.0239582) * 1.931712 + 0.546892)
    out = out.at[:, 0].set(out0)
    out = out.at[:, 1].set(out1)
    return out


if __name__ == "__main__":
    key = jax.random.PRNGKey(0)
    k_src, k_dst, k_edge, k_w1, k_b1, k_w2, k_b2 = jax.random.split(key, 7)

    # Deterministic parameter init (PyTorch Linear-style uniform bounds).
    bound1 = 1.0 / (IN_FEAT ** 0.5)
    bound2 = 1.0 / (HID ** 0.5)
    w1 = jax.random.uniform(k_w1, (IN_FEAT, HID), jnp.float32, -bound1, bound1)
    b1 = jax.random.uniform(k_b1, (HID,), jnp.float32, -bound1, bound1)
    w2 = jax.random.uniform(k_w2, (HID, EDGE_OUT), jnp.float32, -bound2, bound2)
    b2 = jax.random.uniform(k_b2, (EDGE_OUT,), jnp.float32, -bound2, bound2)

    def run_case(E, tile_e):
        ks, kd, ke = jax.random.split(jax.random.fold_in(key, E), 3)
        src = jax.random.normal(ks, (E, NODE_IN), dtype=jnp.float32)
        dest = jax.random.normal(kd, (E, NODE_IN), dtype=jnp.float32)
        edge_attr = jax.random.normal(ke, (E, EDGE_IN), dtype=jnp.float32)
        out = edge_model_forward(src, dest, edge_attr, w1, b1, w2, b2,
                                 tile_e=tile_e)
        out = jax.block_until_ready(out)
        ref = reference_forward(src, dest, edge_attr, w1, b1, w2, b2)
        assert out.shape == (E, EDGE_OUT)
        assert jnp.allclose(out, ref, atol=1e-5, rtol=1e-5), \
            float(jnp.max(jnp.abs(out - ref)))

    # Case 1: E not a multiple of 128 -> exercises the 128-pad path, grid = 1.
    run_case(E=1000, tile_e=131072)
    # Case 2: multi-step "parallel" grid with a partial trailing block
    # (E=5000 -> 40 rows, r_tile=16 rows -> 3 steps: 16 + 16 + 8).
    run_case(E=5000, tile_e=2048)

    print("KERNEL_OK")
</pallas_src>

<mosaic_0001>
module attributes {stable_mosaic.version = 11 : i64} {
  func.func @edge_model_kernel(%arg0: i32, %arg1: memref<15xf32, #tpu.memory_space<smem>>, %arg2: memref<8x128xf32, #tpu.memory_space<vmem>>, %arg3: memref<8x128xf32, #tpu.memory_space<vmem>>, %arg4: memref<3x8x128xf32, #tpu.memory_space<vmem>>, %arg5: memref<3x8x128xf32, #tpu.memory_space<vmem>>) attributes {dimension_semantics = [#tpu.dimension_semantics<parallel>], iteration_bounds = array<i64: 1>, scalar_prefetch = 0 : i64, scratch_operands = 0 : i64, tpu.core_type = #tpu.core_type<tc>, window_params = [{transform_indices = @transform_0, window_bounds = array<i64: 15>}, {transform_indices = @transform_1, window_bounds = array<i64: 8, 128>}, {transform_indices = @transform_2, window_bounds = array<i64: 8, 128>}, {transform_indices = @transform_3, window_bounds = array<i64: 3, 8, 128>}, {transform_indices = @transform_4, window_bounds = array<i64: 3, 8, 128>}]} {
    %c0 = arith.constant 0 : index
    %c0_0 = arith.constant 0 : index
    %0 = vector.load %arg2[%c0, %c0_0] : memref<8x128xf32, #tpu.memory_space<vmem>>, vector<8x128xf32>
    %c0_1 = arith.constant 0 : index
    %c0_2 = arith.constant 0 : index
    %1 = vector.load %arg3[%c0_1, %c0_2] : memref<8x128xf32, #tpu.memory_space<vmem>>, vector<8x128xf32>
    %c0_3 = arith.constant 0 : index
    %c0_4 = arith.constant 0 : index
    %c0_5 = arith.constant 0 : index
    %2 = vector.load %arg4[%c0_3, %c0_4, %c0_5] : memref<3x8x128xf32, #tpu.memory_space<vmem>>, vector<1x8x128xf32>
    %3 = vector.shape_cast %2 : vector<1x8x128xf32> to vector<8x128xf32>
    %c1 = arith.constant 1 : index
    %c0_6 = arith.constant 0 : index
    %c0_7 = arith.constant 0 : index
    %4 = vector.load %arg4[%c1, %c0_6, %c0_7] : memref<3x8x128xf32, #tpu.memory_space<vmem>>, vector<1x8x128xf32>
    %5 = vector.shape_cast %4 : vector<1x8x128xf32> to vector<8x128xf32>
    %c2 = arith.constant 2 : index
    %c0_8 = arith.constant 0 : index
    %c0_9 = arith.constant 0 : index
    %6 = vector.load %arg4[%c2, %c0_8, %c0_9] : memref<3x8x128xf32, #tpu.memory_space<vmem>>, vector<1x8x128xf32>
    %7 = vector.shape_cast %6 : vector<1x8x128xf32> to vector<8x128xf32>
    %c0_10 = arith.constant 0 : index
    %8 = memref.load %arg1[%c0_10] : memref<15xf32, #tpu.memory_space<smem>>
    %9 = vector.broadcast %8 : f32 to vector<8x128xf32>
    %10 = arith.mulf %9, %0 : vector<8x128xf32>
    %c2_11 = arith.constant 2 : index
    %11 = memref.load %arg1[%c2_11] : memref<15xf32, #tpu.memory_space<smem>>
    %12 = vector.broadcast %11 : f32 to vector<8x128xf32>
    %13 = arith.mulf %12, %1 : vector<8x128xf32>
    %14 = arith.addf %10, %13 : vector<8x128xf32>
    %c4 = arith.constant 4 : index
    %15 = memref.load %arg1[%c4] : memref<15xf32, #tpu.memory_space<smem>>
    %16 = vector.broadcast %15 : f32 to vector<8x128xf32>
    %17 = arith.mulf %16, %3 : vector<8x128xf32>
    %18 = arith.addf %14, %17 : vector<8x128xf32>
    %c6 = arith.constant 6 : index
    %19 = memref.load %arg1[%c6] : memref<15xf32, #tpu.memory_space<smem>>
    %20 = vector.broadcast %19 : f32 to vector<8x128xf32>
    %21 = arith.mulf %20, %5 : vector<8x128xf32>
    %22 = arith.addf %18, %21 : vector<8x128xf32>
    %c8 = arith.constant 8 : index
    %23 = memref.load %arg1[%c8] : memref<15xf32, #tpu.memory_space<smem>>
    %24 = vector.broadcast %23 : f32 to vector<8x128xf32>
    %25 = arith.mulf %24, %7 : vector<8x128xf32>
    %26 = arith.addf %22, %25 : vector<8x128xf32>
    %c10 = arith.constant 10 : index
    %27 = memref.load %arg1[%c10] : memref<15xf32, #tpu.memory_space<smem>>
    %28 = vector.broadcast %27 : f32 to vector<8x128xf32>
    %29 = arith.addf %26, %28 : vector<8x128xf32>
    %c1_12 = arith.constant 1 : index
    %30 = memref.load %arg1[%c1_12] : memref<15xf32, #tpu.memory_space<smem>>
    %31 = vector.broadcast %30 : f32 to vector<8x128xf32>
    %32 = arith.mulf %31, %0 : vector<8x128xf32>
    %c3 = arith.constant 3 : index
    %33 = memref.load %arg1[%c3] : memref<15xf32, #tpu.memory_space<smem>>
    %34 = vector.broadcast %33 : f32 to vector<8x128xf32>
    %35 = arith.mulf %34, %1 : vector<8x128xf32>
    %36 = arith.addf %32, %35 : vector<8x128xf32>
    %c5 = arith.constant 5 : index
    %37 = memref.load %arg1[%c5] : memref<15xf32, #tpu.memory_space<smem>>
    %38 = vector.broadcast %37 : f32 to vector<8x128xf32>
    %39 = arith.mulf %38, %3 : vector<8x128xf32>
    %40 = arith.addf %36, %39 : vector<8x128xf32>
    %c7 = arith.constant 7 : index
    %41 = memref.load %arg1[%c7] : memref<15xf32, #tpu.memory_space<smem>>
    %42 = vector.broadcast %41 : f32 to vector<8x128xf32>
    %43 = arith.mulf %42, %5 : vector<8x128xf32>
    %44 = arith.addf %40, %43 : vector<8x128xf32>
    %c9 = arith.constant 9 : index
    %45 = memref.load %arg1[%c9] : memref<15xf32, #tpu.memory_space<smem>>
    %46 = vector.broadcast %45 : f32 to vector<8x128xf32>
    %47 = arith.mulf %46, %7 : vector<8x128xf32>
    %48 = arith.addf %44, %47 : vector<8x128xf32>
    %c11 = arith.constant 11 : index
    %49 = memref.load %arg1[%c11] : memref<15xf32, #tpu.memory_space<smem>>
    %50 = vector.broadcast %49 : f32 to vector<8x128xf32>
    %51 = arith.addf %48, %50 : vector<8x128xf32>
    %cst = arith.constant 0.000000e+00 : f32
    %52 = vector.broadcast %cst : f32 to vector<8x128xf32>
    %53 = arith.maximumf %29, %52 : vector<8x128xf32>
    %cst_13 = arith.constant 0.000000e+00 : f32
    %54 = vector.broadcast %cst_13 : f32 to vector<8x128xf32>
    %55 = arith.maximumf %51, %54 : vector<8x128xf32>
    %c12 = arith.constant 12 : index
    %56 = memref.load %arg1[%c12] : memref<15xf32, #tpu.memory_space<smem>>
    %57 = vector.broadcast %56 : f32 to vector<8x128xf32>
    %58 = arith.mulf %57, %53 : vector<8x128xf32>
    %c13 = arith.constant 13 : index
    %59 = memref.load %arg1[%c13] : memref<15xf32, #tpu.memory_space<smem>>
    %60 = vector.broadcast %59 : f32 to vector<8x128xf32>
    %61 = arith.mulf %60, %55 : vector<8x128xf32>
    %62 = arith.addf %58, %61 : vector<8x128xf32>
    %c14 = arith.constant 14 : index
    %63 = memref.load %arg1[%c14] : memref<15xf32, #tpu.memory_space<smem>>
    %64 = vector.broadcast %63 : f32 to vector<8x128xf32>
    %65 = arith.addf %62, %64 : vector<8x128xf32>
    %cst_14 = arith.constant 0.948413908 : f32
    %66 = vector.broadcast %cst_14 : f32 to vector<8x128xf32>
    %67 = arith.divf %0, %66 : vector<8x128xf32>
    %cst_15 = arith.constant 0.212321401 : f32
    %68 = vector.broadcast %cst_15 : f32 to vector<8x128xf32>
    %69 = arith.subf %1, %68 : vector<8x128xf32>
    %70 = arith.subf %67, %69 : vector<8x128xf32>
    %cst_16 = arith.constant -1.32484317 : f32
    %71 = vector.broadcast %cst_16 : f32 to vector<8x128xf32>
    %72 = arith.mulf %70, %71 : vector<8x128xf32>
    %73 = math.absf %72 : vector<8x128xf32>
    %cst_17 = arith.constant 1.73484612 : f32
    %74 = vector.broadcast %cst_17 : f32 to vector<8x128xf32>
    %75 = arith.subf %3, %74 : vector<8x128xf32>
    %76 = arith.addf %75, %7 : vector<8x128xf32>
    %77 = arith.addf %76, %1 : vector<8x128xf32>
    %cst_18 = arith.constant -0.120847188 : f32
    %78 = vector.broadcast %cst_18 : f32 to vector<8x128xf32>
    %79 = arith.mulf %77, %78 : vector<8x128xf32>
    %80 = arith.addf %73, %79 : vector<8x128xf32>
    %cst_19 = arith.constant 1.05843616 : f32
    %81 = vector.broadcast %cst_19 : f32 to vector<8x128xf32>
    %82 = arith.mulf %1, %81 : vector<8x128xf32>
    %83 = arith.subf %0, %82 : vector<8x128xf32>
    %cst_20 = arith.constant 1.53442109 : f32
    %84 = vector.broadcast %cst_20 : f32 to vector<8x128xf32>
    %85 = arith.mulf %83, %84 : vector<8x128xf32>
    %cst_21 = arith.constant 0.453681082 : f32
    %86 = vector.broadcast %cst_21 : f32 to vector<8x128xf32>
    %87 = arith.addf %85, %86 : vector<8x128xf32>
    %88 = math.absf %87 : vector<8x128xf32>
    %cst_22 = arith.constant 1.02395821 : f32
    %89 = vector.broadcast %cst_22 : f32 to vector<8x128xf32>
    %90 = arith.mulf %1, %89 : vector<8x128xf32>
    %91 = arith.subf %0, %90 : vector<8x128xf32>
    %cst_23 = arith.constant 1.93171203 : f32
    %92 = vector.broadcast %cst_23 : f32 to vector<8x128xf32>
    %93 = arith.mulf %91, %92 : vector<8x128xf32>
    %94 = arith.addf %88, %93 : vector<8x128xf32>
    %cst_24 = arith.constant 5.468920e-01 : f32
    %95 = vector.broadcast %cst_24 : f32 to vector<8x128xf32>
    %96 = arith.addf %94, %95 : vector<8x128xf32>
    %c0_25 = arith.constant 0 : index
    %c0_26 = arith.constant 0 : index
    %c0_27 = arith.constant 0 : index
    %97 = vector.load %arg5[%c0_25, %c0_26, %c0_27] : memref<3x8x128xf32, #tpu.memory_space<vmem>>, vector<1x8x128xf32>
    %98 = vector.shape_cast %97 : vector<1x8x128xf32> to vector<8x128xf32>
    %99 = vector.shape_cast %80 : vector<8x128xf32> to vector<1x8x128xf32>
    tpu.vector_store %arg5[%c0_25, %c0_26, %c0_27], %99 {strides = array<i32>} : memref<3x8x128xf32, #tpu.memory_space<vmem>>, vector<1x8x128xf32>,
    %c1_28 = arith.constant 1 : index
    %c0_29 = arith.constant 0 : index
    %c0_30 = arith.constant 0 : index
    %100 = vector.load %arg5[%c1_28, %c0_29, %c0_30] : memref<3x8x128xf32, #tpu.memory_space<vmem>>, vector<1x8x128xf32>
    %101 = vector.shape_cast %100 : vector<1x8x128xf32> to vector<8x128xf32>
    %102 = vector.shape_cast %96 : vector<8x128xf32> to vector<1x8x128xf32>
    tpu.vector_store %arg5[%c1_28, %c0_29, %c0_30], %102 {strides = array<i32>} : memref<3x8x128xf32, #tpu.memory_space<vmem>>, vector<1x8x128xf32>,
    %c2_31 = arith.constant 2 : index
    %c0_32 = arith.constant 0 : index
    %c0_33 = arith.constant 0 : index
    %103 = vector.load %arg5[%c2_31, %c0_32, %c0_33] : memref<3x8x128xf32, #tpu.memory_space<vmem>>, vector<1x8x128xf32>
    %104 = vector.shape_cast %103 : vector<1x8x128xf32> to vector<8x128xf32>
    %105 = vector.shape_cast %65 : vector<8x128xf32> to vector<1x8x128xf32>
    tpu.vector_store %arg5[%c2_31, %c0_32, %c0_33], %105 {strides = array<i32>} : memref<3x8x128xf32, #tpu.memory_space<vmem>>, vector<1x8x128xf32>,
    return
  }
  func.func @transform_0(%arg0: i32) -> i32 {
    %c0_i32 = arith.constant 0 : i32
    %c0_i32_0 = arith.constant 0 : i32
    return %c0_i32 : i32
  }
  func.func @transform_1(%arg0: i32) -> (i32, i32) {
    %c0_i32 = arith.constant 0 : i32
    %c0_i32_0 = arith.constant 0 : i32
    return %arg0, %c0_i32 : i32, i32
  }
  func.func @transform_2(%arg0: i32) -> (i32, i32) {
    %c0_i32 = arith.constant 0 : i32
    %c0_i32_0 = arith.constant 0 : i32
    return %arg0, %c0_i32 : i32, i32
  }
  func.func @transform_3(%arg0: i32) -> (i32, i32, i32) {
    %c0_i32 = arith.constant 0 : i32
    %c0_i32_0 = arith.constant 0 : i32
    %c0_i32_1 = arith.constant 0 : i32
    return %c0_i32, %arg0, %c0_i32_0 : i32, i32, i32
  }
  func.func @transform_4(%arg0: i32) -> (i32, i32, i32) {
    %c0_i32 = arith.constant 0 : i32
    %c0_i32_0 = arith.constant 0 : i32
    %c0_i32_1 = arith.constant 0 : i32
    return %c0_i32, %arg0, %c0_i32_0 : i32, i32, i32
  }
}

</mosaic_0001>

<bundles_post_ra>
// kernel: edge_model_forward_feature_major.1
= control target key start
LH: loop header
LB: loop body
LE: loop exit
PB: predicated region body
PF: predicated region fallthrough
CT: control target
= control target key end

     0   :  { %9 = vsyncpa [#allocation3], 0  ;;  %s227_s0 = inlined_call_operand.vmem [shape: f32[15], index: 0, kind: input, shape index: {}]   ;;  %s228_s1 = inlined_call_operand.vmem [shape: f32[8,128], index: 1, kind: input, shape index: {}]   ;;  %s229_s2 = inlined_call_operand.vmem [shape: f32[8,128], index: 2, kind: input, shape index: {}]   ;;  %s230_s3 = inlined_call_operand.vmem [shape: f32[3,8,128], index: 3, kind: input, shape index: {}]   ;;  %s231_s4 = inlined_call_operand.vmem [shape: f32[3,8,128], index: 4, kind: output, shape index: {}]  }
   0x1   :  { %s16_s17 = sshll.u32 %s227_s0, 4  ;;  %s17_s17 = int_to_ptr.vmem [resolvable:$true] %s16_s17 }
   0x2   :  { %s145_s18 = scalar_lea.vmem %s17_s17, 16  ;;  %p150_p1 = scmp.lt.s32.totalorder %s17_s17, %s17_s17 }
   0x3   :  { %p146_p0 = scmp.ne.s32.totalorder %s17_s17, %s145_s18  ;;  %p151_p2 = scmp.lt.s32.totalorder %s145_s18, %s145_s18 }
   0x5   :  { %p152_p3 = por %p151_p2, %p150_p1 }
   0x7   :  { %p153_p4 = pnand %p152_p3, %p146_p0 }
   0x9   :  { %156 = shalt.err (!%p153_p4)
}
   0xa   :  { %s159_s19 = smov [#allocation2]  }
   0xb   :  { %19 = dma.vmem_to_smem %s17_s17, 16, %s159_s19, [#allocation3]  }
   0xc   :  { %157 = dma.done.wait [#allocation3], 16  }
   0xd   :  { %158 = vsyncadd [#allocation3], 4294967280 }
   0xe   :  { %29 = sfence }
   0xf   :  { %s127_s20 = sld [smem:[#allocation2 + $0x4]]  ;;  %v30_v0 = vld [vmem:[%s228_s1] sm:$0xff]  ;;  %s197_s26 = sld [smem:[#allocation2 + $0x8]]  ;;  %v125_v8 = vld [vmem:[%s230_s3 + $0x10] sm:$0xff]  ;;  %v124_v22 = vld [vmem:[%s230_s3 + $0x8] sm:$0xff] }
  0x10   :  { %v31_v1 = vld [vmem:[%s229_s2] sm:$0xff]  ;;  %s199_s27 = sld [smem:[#allocation2 + $0x5]]  ;;  %v94_v3 = vmul.f32 1.054392, %v30_v0  ;;  %s37_s1 = sld [smem:[#allocation2]] }
  0x11   :  { %v32_v2 = vld [vmem:[%s230_s3] sm:$0xff]  ;;  %v140_v4 = vadd.f32 -0.2123214, %v31_v1  ;;  %v104_v6 = vmul.f32 1.0584362, %v31_v1  ;;  %s126_s2 = sld [smem:[#allocation2 + $0x2]] }
  0x12   :  { %v141_v5 = vadd.f32 -1.7348461, %v32_v2  ;;  %v109_v7 = vmul.f32 1.0239582, %v31_v1  ;;  %s128_s30 = sld [smem:[#allocation2 + $0x6]]  ;;  %s131_s5 = sld [smem:[#allocation2 + $0x1]] }
  0x13   :  { %v96_v9 = vsub.f32 %v94_v3, %v140_v4  ;;  %v105_v11 = vsub.f32 %v30_v0, %v104_v6  ;;  %s132_s6 = sld [smem:[#allocation2 + $0x3]]  ;;  %s204_s7 = sld [smem:[#allocation2 + $0x9]] }
  0x14   :  { %v100_v10 = vadd.f32 %v141_v5, %v125_v8  ;;  %v110_v14 = vsub.f32 %v30_v0, %v109_v7  ;;  %s206_s8 = sld [smem:[#allocation2 + $0x7]]  ;;  %s212_s11 = sld [smem:[#allocation2 + $0xa]] }
  0x15   :  { %v45_v12 = vstv %s127_s20  ;;  %v97_v13 = vmul.f32 -1.3248432, %v96_v9  ;;  %v106_v19 = vmul.f32 1.5344211, %v105_v11  ;;  %v53_v29 = vstv %s197_s26  ;;  %s136_s3 = sld [smem:[#allocation2 + $0xb]]  ;;  %s137_s14 = sld [smem:[#allocation2 + $0xc]] }
  0x16   :  { %v101_v15 = vadd.f32 %v100_v10, %v31_v1  ;;  %v46_v17 = vmul.f32 %v45_v12, %v32_v2  ;;  %v67_v20 = vstv %s199_s27  ;;  %v111_v21 = vmul.f32 1.931712, %v110_v14  ;;  %s138_s15 = sld [smem:[#allocation2 + $0xd]]  ;;  %s139_s18 = sld [smem:[#allocation2 + $0xe]] }
  0x17   :  { %v98_v16 = vand.u32 2147483647, %v97_v13  ;;  %v38_v23 = vstv %s37_s1  ;;  %v41_v24 = vstv %s126_s2  ;;  %v107_v26 = vadd.f32 0.45368108, %v106_v19 }
  0x18   :  { %v102_v18 = vmul.f32 -0.12084719, %v101_v15  ;;  %v39_v27 = vmul.f32 %v38_v23, %v30_v0  ;;  %v42_v28 = vmul.f32 %v41_v24, %v31_v1  ;;  %v49_v30 = vstv %s128_s30 }
  0x19   :  { %v60_v31 = vstv %s131_s5  ;;  %v63_v32 = vstv %s132_s6  ;;  %v108_v33 = vand.u32 2147483647, %v107_v26  ;;  %v50_v35 = vmul.f32 %v124_v22, %v49_v30 }
  0x1a   :  { %v103_v25 = vadd.f32 %v102_v18, %v98_v16  ;;  %v43_v34 = vadd.f32 %v42_v28, %v39_v27  ;;  %v61_v36 = vmul.f32 %v60_v31, %v30_v0  ;;  %v68_v37 = vmul.f32 %v67_v20, %v32_v2 }
  0x1b   :  { %v64_v38 = vmul.f32 %v63_v32, %v31_v1  ;;  %v71_v39 = vstv %s206_s8  ;;  %v54_v40 = vmul.f32 %v125_v8, %v53_v29  ;;  %v75_v41 = vstv %s204_s7 }
  0x1c   :  { %114 = vst [vmem:[%s231_s4] sm:$0xff] %v103_v25  ;;  %v112_v42 = vadd.f32 %v111_v21, %v108_v33  ;;  %v47_v43 = vadd.f32 %v46_v17, %v43_v34  ;;  %v72_v45 = vmul.f32 %v124_v22, %v71_v39  ;;  %v76_v48 = vmul.f32 %v125_v8, %v75_v41 }
  0x1d   :  { %v65_v44 = vadd.f32 %v64_v38, %v61_v36  ;;  %v57_v49 = vstv %s212_s11  ;;  %v79_v54 = vstv %s136_s3  ;;  %v84_v57 = vstv %s137_s14 }
  0x1e   :  { %v113_v46 = vadd.f32 0.546892, %v112_v42  ;;  %v51_v47 = vadd.f32 %v50_v35, %v47_v43  ;;  %v87_v59 = vstv %s138_s15  ;;  %v91_v63 = vstv %s139_s18 }
  0x1f   :  { %v69_v50 = vadd.f32 %v68_v37, %v65_v44 }
  0x20   :  { %142 = vst [vmem:[%s231_s4 + $0x8] sm:$0xff] %v113_v46  ;;  %v55_v51 = vadd.f32 %v54_v40, %v51_v47 }
  0x21   :  { %v73_v52 = vadd.f32 %v72_v45, %v69_v50 }
  0x22   :  { %v58_v53 = vadd.f32 %v57_v49, %v55_v51 }
  0x23   :  { %v77_v55 = vadd.f32 %v76_v48, %v73_v52 }
  0x24   :  { %v81_v56 = vmax.f32 %v58_v53, 0.0 }
  0x25   :  { %v80_v58 = vadd.f32 %v79_v54, %v77_v55 }
  0x26   :  { %v85_v61 = vmul.f32 %v84_v57, %v81_v56 }
  0x27   :  { %v82_v60 = vmax.f32 %v80_v58, 0.0 }
  0x29   :  { %v88_v62 = vmul.f32 %v87_v59, %v82_v60 }
  0x2b   :  { %v89_v0 = vadd.f32 %v88_v62, %v85_v61 }
  0x2d   :  { %v92_v1 = vadd.f32 %v91_v63, %v89_v0 }
  0x2f   :  { %143 = vst [vmem:[%s231_s4 + $0x10] sm:$0xff] %v92_v1 }
  0x30   :  { %123 = vsyncpa [#allocation3], 1 }

</bundles_post_ra>
